<compile_context>
chip_gen: v6e
topology: v6e:2x2x1
jax: 0.10.0
libtpu: 0.0.40
codegen_flags: <defaults>
</compile_context>

<pallas_src>
from functools import partial

import numpy as np
import jax
import jax.numpy as jnp
from jax.experimental import pallas as pl
from jax.experimental.pallas import tpu as pltpu


def _round_up(x, m):
    return ((x + m - 1) // m) * m


def _mmd_tile_kernel(neg_ref, ti_ref, tj_ref, w_ref,          # scalar prefetch (SMEM)
                     zi_ref, zj_ref, sqi_ref, sqj_ref,         # tensor inputs (VMEM)
                     rx_ref, ry_ref, cy_ref,
                     out_ref,                                   # resident accumulator
                     rsy_ref,                                   # VMEM scratch (t,1)
                     *, x_size, tile):
    p = pl.program_id(0)
    s = pl.program_id(1)

    # Accumulator block (one per parallel chunk) is resident across the
    # "arbitrary" s axis; zero it once.
    @pl.when(s == 0)
    def _init():
        out_ref[...] = jnp.zeros_like(out_ref)

    zi = zi_ref[...]                                   # (t, D) f32
    zj = zj_ref[...]                                   # (t, D) f32

    # Gram tile on the MXU: contract feature axes of both operands (no .T).
    gram = jax.lax.dot_general(
        zi, zj, (((1,), (1,)), ((), ())), preferred_element_type=jnp.float32)

    # Pairwise squared distances (padded rows/cols have poisoned |z|^2 -> huge
    # d2 -> K == 0 exactly, so no padding mask is needed below).
    d2 = jnp.maximum(sqi_ref[...] + sqj_ref[...] - 2.0 * gram, 0.0)

    # K = sum_k exp(-d2 / (bw * m_k)), m_k in (0.25, 0.5, 1, 2, 4)
    #   = r + r^2 + r^4 + r^8 + r^16 with r = exp(-d2/(4*bw))  (1 EUP exp/elem)
    r = jnp.exp(d2 * neg_ref[0])                       # neg_ref[0] = -1/(4*bw)
    r2 = r * r
    r4 = r2 * r2
    r8 = r4 * r4
    K = r + r2 + r4 + r8 + r8 * r8

    rs_full = jnp.sum(K, axis=1, keepdims=True)        # (t,1): all valid cols

    # Column-tile classification from the prefetched tile index (scalar SMEM).
    tj_v = tj_ref[p, s]
    col_lo = tj_v * tile
    all_x = (col_lo + tile) <= x_size                  # columns entirely in X
    all_y = col_lo >= x_size                           # entirely in Y (or pad)

    @pl.when(all_x)
    def _():
        rsy_ref[...] = jnp.zeros_like(rsy_ref)

    @pl.when(all_y)
    def _():
        rsy_ref[...] = rs_full

    @pl.when(jnp.logical_not(jnp.logical_or(all_x, all_y)))
    def _():                                           # x_size-straddling tile only
        rsy_ref[...] = jnp.sum(K * cy_ref[...], axis=1, keepdims=True)

    rs_y = rsy_ref[...]
    rs_x = rs_full - rs_y
    rx = rx_ref[...]                                   # (t,1) row-in-X mask
    ry = ry_ref[...]                                   # (t,1) row-in-Y mask

    sxx = jnp.sum(rs_x * rx)                           # rows in X, cols in X
    syy = jnp.sum(rs_y * ry)                           # rows in Y, cols in Y
    sxy = jnp.sum(rs_y * rx) + jnp.sum(rs_x * ry)      # both XY orientations

    # w = 2 for off-diagonal tiles (mirror tile never evaluated), 1 on the
    # diagonal, 0 for padded grid steps.  K symmetry makes this exact; the
    # diagonal tile has equal XY orientations, hence the 0.5 factor.
    w = w_ref[p, s]
    out_ref[0, 0] = out_ref[0, 0] + w * sxx
    out_ref[0, 1] = out_ref[0, 1] + (0.5 * w) * sxy
    out_ref[0, 2] = out_ref[0, 2] + w * syy


def mmd_loss(X, Y, *, tile=512):
    """Pallas TPU implementation of MMDLoss.forward(X, Y)."""
    X = jnp.asarray(X, jnp.float32)
    Y = jnp.asarray(Y, jnp.float32)
    xs, d = int(X.shape[0]), int(X.shape[1])
    ys = int(Y.shape[0])
    n_total = xs + ys
    # TODO(synk): xs == 0 or ys == 0 divides by zero in the quadrant means,
    # exactly like the original PyTorch module (NaN guard then returns 0).

    # Tile choice: shrink from `tile` while keeping a 128 multiple so the
    # per-step working set stays well under v7x's 32 MiB default scoped VMEM;
    # for small n use one full-size tile rounded to the sublane multiple.
    t = int(tile)
    while t > 128 and (4 * t * d * 4 + 8 * t * t * 4) > (24 << 20):
        t //= 2
    if n_total <= t:
        t = max(8, _round_up(n_total, 8))
    n_pad = _round_up(n_total, t)
    n_ti = n_pad // t

    Z = jnp.concatenate([X, Y], axis=0)               # torch.vstack([X, Y])
    Zp = jnp.pad(Z, ((0, n_pad - n_total), (0, 0)))

    # Analytic bandwidth in O(nD): sum_ij d2 = 2*n*sum|z_i|^2 - 2*|sum_i z_i|^2
    sq = jnp.sum(Zp * Zp, axis=1, keepdims=True)      # (n_pad,1); padded rows 0
    zsum = jnp.sum(Zp, axis=0)
    sum_d2 = jnp.maximum(
        2.0 * n_total * jnp.sum(sq) - 2.0 * jnp.sum(zsum * zsum), 0.0)
    bandwidth = sum_d2 / float(n_total * n_total - n_total)
    neg_inv_4bw = (-0.25 / bandwidth).reshape(1).astype(jnp.float32)

    # Precomputed masks / poisoned squared norms (padded rows get a huge |z|^2
    # so their kernel entries underflow to exactly 0 inside the kernel).
    idx = jnp.arange(n_pad, dtype=jnp.int32)
    rx = (idx < xs).astype(jnp.float32).reshape(n_pad, 1)
    ry = jnp.logical_and(idx >= xs, idx < n_total).astype(jnp.float32).reshape(n_pad, 1)
    cy = ry.reshape(1, n_pad)
    sqp = jnp.where((idx < n_total).reshape(n_pad, 1), sq, jnp.float32(1e30))
    sqc = sqp.reshape(1, n_pad)

    # Upper-triangular step list, split into chunks for megacore (v7x: 2 TCs).
    pairs = [(i, j) for i in range(n_ti) for j in range(i, n_ti)]
    n_steps = len(pairs)
    n_par = 2 if n_steps >= 2 else 1
    spc = -(-n_steps // n_par)                         # steps per chunk (padded)
    ti_tab = np.zeros((n_par, spc), np.int32)
    tj_tab = np.zeros((n_par, spc), np.int32)
    w_tab = np.zeros((n_par, spc), np.float32)         # 0 on padded steps
    for k, (i, j) in enumerate(pairs):
        p, s = divmod(k, spc)
        ti_tab[p, s] = i
        tj_tab[p, s] = j
        w_tab[p, s] = 1.0 if i == j else 2.0

    kern = partial(_mmd_tile_kernel, x_size=xs, tile=t)
    out = pl.pallas_call(
        kern,
        out_shape=jax.ShapeDtypeStruct((n_par, 3, 8, 128), jnp.float32),
        grid_spec=pltpu.PrefetchScalarGridSpec(
            num_scalar_prefetch=4,                      # neg, ti, tj, w tables
            grid=(n_par, spc),
            in_specs=[
                pl.BlockSpec((t, d), lambda p, s, neg, ti, tj, w: (ti[p, s], 0)),  # Z rows
                pl.BlockSpec((t, d), lambda p, s, neg, ti, tj, w: (tj[p, s], 0)),  # Z cols
                pl.BlockSpec((t, 1), lambda p, s, neg, ti, tj, w: (ti[p, s], 0)),  # |z|^2 rows
                pl.BlockSpec((1, t), lambda p, s, neg, ti, tj, w: (0, tj[p, s])),  # |z|^2 cols
                pl.BlockSpec((t, 1), lambda p, s, neg, ti, tj, w: (ti[p, s], 0)),  # row-in-X
                pl.BlockSpec((t, 1), lambda p, s, neg, ti, tj, w: (ti[p, s], 0)),  # row-in-Y
                pl.BlockSpec((1, t), lambda p, s, neg, ti, tj, w: (0, tj[p, s])),  # col-in-Y
            ],
            out_specs=pl.BlockSpec((1, 3, 8, 128),
                                   lambda p, s, neg, ti, tj, w: (p, 0, 0, 0)),
            scratch_shapes=[pltpu.VMEM((t, 1), jnp.float32)],
        ),
        compiler_params=pltpu.CompilerParams(
            dimension_semantics=("parallel", "arbitrary")),
    )(neg_inv_4bw, jnp.asarray(ti_tab), jnp.asarray(tj_tab), jnp.asarray(w_tab),
      Zp, Zp, sqp, sqc, rx, ry, cy)

    # Every element of each accumulator block holds the chunk's total.
    SXX = jnp.sum(out[:, 0, 0, 0])
    SXY = jnp.sum(out[:, 1, 0, 0])
    SYY = jnp.sum(out[:, 2, 0, 0])
    XX = SXX / float(xs * xs)
    XY = SXY / float(xs * ys)
    YY = SYY / float(ys * ys)
    res = (XX - 2.0 * XY + YY) / (XX + YY + 1e-8)
    # torch.isnan(XX + XY + YY) -> return 0  (returned as a 0.0 scalar here)
    return jnp.where(jnp.isnan(XX + XY + YY), jnp.float32(0.0), res)


def _mmd_loss_ref(X, Y):
    """Pure-JAX reference mirroring the PyTorch module (sanity check)."""
    Z = jnp.concatenate([X, Y], axis=0).astype(jnp.float32)
    n = Z.shape[0]
    diff = Z[:, None, :] - Z[None, :, :]
    d2 = jnp.sum(diff * diff, axis=-1)
    bw = jnp.sum(d2) / (n * n - n)
    mult = jnp.asarray([0.25, 0.5, 1.0, 2.0, 4.0], jnp.float32)
    K = jnp.sum(jnp.exp(-d2[None, ...] / (bw * mult)[:, None, None]), axis=0)
    xs = X.shape[0]
    XX = jnp.mean(K[:xs, :xs])
    XY = jnp.mean(K[:xs, xs:])
    YY = jnp.mean(K[xs:, xs:])
    return (XX - 2.0 * XY + YY) / (XX + YY + 1e-8)


if __name__ == "__main__":
    key = jax.random.PRNGKey(0)
    kx, ky, ka, kb, kc, kd = jax.random.split(key, 6)

    # Small case (single tile path): X, Y are (batch, features).
    X = jax.random.normal(kx, (8, 32), dtype=jnp.float32)
    Y = jax.random.normal(ky, (8, 32), dtype=jnp.float32) + 0.5
    out = mmd_loss(X, Y)
    jax.block_until_ready(out)
    ref = _mmd_loss_ref(X, Y)
    assert jnp.allclose(out, ref, rtol=2e-4, atol=2e-5), (out, ref)

    # Multi-tile case (triangular grid, straddling column tile, padded tail).
    X2 = jax.random.normal(ka, (72, 32), dtype=jnp.float32)
    Y2 = jax.random.normal(kb, (88, 32), dtype=jnp.float32) + 0.25
    out2 = mmd_loss(X2, Y2, tile=128)
    jax.block_until_ready(out2)
    ref2 = _mmd_loss_ref(X2, Y2)
    assert jnp.allclose(out2, ref2, rtol=2e-4, atol=2e-5), (out2, ref2)

    # Default tile=512 path with two row/column tiles and megacore chunking.
    X3 = jax.random.normal(kc, (280, 16), dtype=jnp.float32)
    Y3 = jax.random.normal(kd, (312, 16), dtype=jnp.float32) + 0.1
    out3 = mmd_loss(X3, Y3)
    jax.block_until_ready(out3)
    ref3 = _mmd_loss_ref(X3, Y3)
    assert jnp.allclose(out3, ref3, rtol=2e-4, atol=2e-5), (out3, ref3)

    print("KERNEL_OK")
</pallas_src>

<mosaic_0001>
module attributes {stable_mosaic.version = 11 : i64} {
  func.func @_mmd_tile_kernel(%arg0: i32, %arg1: i32, %arg2: memref<1xf32, #tpu.memory_space<smem>>, %arg3: memref<1x1xi32, #tpu.memory_space<smem>>, %arg4: memref<1x1xi32, #tpu.memory_space<smem>>, %arg5: memref<1x1xf32, #tpu.memory_space<smem>>, %arg6: memref<16x32xf32, #tpu.memory_space<vmem>>, %arg7: memref<16x32xf32, #tpu.memory_space<vmem>>, %arg8: memref<16x1xf32, #tpu.memory_space<vmem>>, %arg9: memref<1x16xf32, #tpu.memory_space<vmem>>, %arg10: memref<16x1xf32, #tpu.memory_space<vmem>>, %arg11: memref<16x1xf32, #tpu.memory_space<vmem>>, %arg12: memref<1x16xf32, #tpu.memory_space<vmem>>, %arg13: memref<1x3x8x128xf32, #tpu.memory_space<vmem>>, %arg14: memref<16x1xf32, #tpu.memory_space<vmem>>) attributes {dimension_semantics = [#tpu.dimension_semantics<parallel>, #tpu.dimension_semantics<arbitrary>], iteration_bounds = array<i64: 1, 1>, scalar_prefetch = 4 : i64, scratch_operands = 1 : i64, tpu.core_type = #tpu.core_type<tc>, window_params = [{transform_indices = @transform_0, window_bounds = array<i64: 16, 32>}, {transform_indices = @transform_1, window_bounds = array<i64: 16, 32>}, {transform_indices = @transform_2, window_bounds = array<i64: 16, 1>}, {transform_indices = @transform_3, window_bounds = array<i64: 1, 16>}, {transform_indices = @transform_4, window_bounds = array<i64: 16, 1>}, {transform_indices = @transform_5, window_bounds = array<i64: 16, 1>}, {transform_indices = @transform_6, window_bounds = array<i64: 1, 16>}, {transform_indices = @transform_7, window_bounds = array<i64: 1, 3, 8, 128>}]} {
    %c0_i32 = arith.constant 0 : i32
    %0 = arith.cmpi eq, %arg1, %c0_i32 : i32
    %1 = arith.extui %0 : i1 to i32
    %c0_i32_0 = arith.constant 0 : i32
    %2 = arith.cmpi ne, %1, %c0_i32_0 : i32
    scf.if %2 {
      %cst_50 = arith.constant 0.000000e+00 : f32
      %98 = vector.broadcast %cst_50 : f32 to vector<1x3x8x128xf32>
      %c0_51 = arith.constant 0 : index
      %c0_52 = arith.constant 0 : index
      %c0_53 = arith.constant 0 : index
      %c0_54 = arith.constant 0 : index
      %99 = vector.load %arg13[%c0_51, %c0_52, %c0_53, %c0_54] : memref<1x3x8x128xf32, #tpu.memory_space<vmem>>, vector<1x3x8x128xf32>
      tpu.vector_store %arg13[%c0_51, %c0_52, %c0_53, %c0_54], %98 {strides = array<i32>} : memref<1x3x8x128xf32, #tpu.memory_space<vmem>>, vector<1x3x8x128xf32>,
    } else {
    }
    %c0 = arith.constant 0 : index
    %c0_1 = arith.constant 0 : index
    %3 = vector.load %arg6[%c0, %c0_1] : memref<16x32xf32, #tpu.memory_space<vmem>>, vector<16x32xf32>
    %c0_2 = arith.constant 0 : index
    %c0_3 = arith.constant 0 : index
    %4 = vector.load %arg7[%c0_2, %c0_3] : memref<16x32xf32, #tpu.memory_space<vmem>>, vector<16x32xf32>
    %cst = arith.constant dense<0.000000e+00> : vector<16x16xf32>
    %5 = tpu.matmul %3, %4, %cst {dimension_numbers = #tpu.dot_dimension_numbers<[1], [1], [0], [0], [0, 0, 1, 0], [], []>} : vector<16x32xf32>, vector<16x32xf32>, vector<16x16xf32> -> vector<16x16xf32>
    %c0_4 = arith.constant 0 : index
    %c0_5 = arith.constant 0 : index
    %6 = vector.load %arg8[%c0_4, %c0_5] : memref<16x1xf32, #tpu.memory_space<vmem>>, vector<16x1xf32>
    %c0_6 = arith.constant 0 : index
    %c0_7 = arith.constant 0 : index
    %7 = vector.load %arg9[%c0_6, %c0_7] : memref<1x16xf32, #tpu.memory_space<vmem>>, vector<1x16xf32>
    %8 = vector.broadcast %6 : vector<16x1xf32> to vector<16x16xf32>
    %9 = vector.broadcast %7 : vector<1x16xf32> to vector<16x16xf32>
    %10 = arith.addf %8, %9 : vector<16x16xf32>
    %cst_8 = arith.constant 2.000000e+00 : f32
    %11 = vector.broadcast %cst_8 : f32 to vector<16x16xf32>
    %12 = arith.mulf %11, %5 : vector<16x16xf32>
    %13 = arith.subf %10, %12 : vector<16x16xf32>
    %cst_9 = arith.constant 0.000000e+00 : f32
    %14 = vector.broadcast %cst_9 : f32 to vector<16x16xf32>
    %15 = arith.maximumf %13, %14 : vector<16x16xf32>
    %c0_10 = arith.constant 0 : index
    %16 = memref.load %arg2[%c0_10] : memref<1xf32, #tpu.memory_space<smem>>
    %17 = vector.broadcast %16 : f32 to vector<16x16xf32>
    %18 = arith.mulf %15, %17 : vector<16x16xf32>
    %19 = math.exp %18 : vector<16x16xf32>
    %20 = arith.mulf %19, %19 : vector<16x16xf32>
    %21 = arith.mulf %20, %20 : vector<16x16xf32>
    %22 = arith.mulf %21, %21 : vector<16x16xf32>
    %23 = arith.addf %19, %20 : vector<16x16xf32>
    %24 = arith.addf %23, %21 : vector<16x16xf32>
    %25 = arith.addf %24, %22 : vector<16x16xf32>
    %26 = arith.mulf %22, %22 : vector<16x16xf32>
    %27 = arith.addf %25, %26 : vector<16x16xf32>
    %cst_11 = arith.constant dense<0.000000e+00> : vector<16xf32>
    %28 = vector.multi_reduction <add>, %27, %cst_11 [1] : vector<16x16xf32> to vector<16xf32>
    %29 = vector.shape_cast %28 : vector<16xf32> to vector<16x1xf32>
    %30 = arith.index_cast %arg0 : i32 to index
    %31 = arith.index_cast %arg1 : i32 to index
    %32 = memref.load %arg4[%30, %31] : memref<1x1xi32, #tpu.memory_space<smem>>
    %c16_i32 = arith.constant 16 : i32
    %33 = arith.muli %32, %c16_i32 : i32
    %c16_i32_12 = arith.constant 16 : i32
    %34 = arith.addi %33, %c16_i32_12 : i32
    %c8_i32 = arith.constant 8 : i32
    %35 = arith.cmpi sle, %34, %c8_i32 : i32
    %c8_i32_13 = arith.constant 8 : i32
    %36 = arith.cmpi sge, %33, %c8_i32_13 : i32
    %37 = arith.extui %35 : i1 to i32
    %c0_i32_14 = arith.constant 0 : i32
    %38 = arith.cmpi ne, %37, %c0_i32_14 : i32
    scf.if %38 {
      %cst_50 = arith.constant 0.000000e+00 : f32
      %98 = vector.broadcast %cst_50 : f32 to vector<16x1xf32>
      %c0_51 = arith.constant 0 : index
      %c0_52 = arith.constant 0 : index
      %99 = vector.load %arg14[%c0_51, %c0_52] : memref<16x1xf32, #tpu.memory_space<vmem>>, vector<16x1xf32>
      tpu.vector_store %arg14[%c0_51, %c0_52], %98 {strides = array<i32>} : memref<16x1xf32, #tpu.memory_space<vmem>>, vector<16x1xf32>,
    } else {
    }
    %39 = arith.extui %36 : i1 to i32
    %c0_i32_15 = arith.constant 0 : i32
    %40 = arith.cmpi ne, %39, %c0_i32_15 : i32
    scf.if %40 {
      %c0_50 = arith.constant 0 : index
      %c0_51 = arith.constant 0 : index
      %98 = vector.load %arg14[%c0_50, %c0_51] : memref<16x1xf32, #tpu.memory_space<vmem>>, vector<16x1xf32>
      tpu.vector_store %arg14[%c0_50, %c0_51], %29 {strides = array<i32>} : memref<16x1xf32, #tpu.memory_space<vmem>>, vector<16x1xf32>,
    } else {
    }
    %41 = arith.ori %35, %36 : i1
    %true = arith.constant true
    %42 = arith.xori %41, %true : i1
    %43 = arith.extui %42 : i1 to i32
    %c0_i32_16 = arith.constant 0 : i32
    %44 = arith.cmpi ne, %43, %c0_i32_16 : i32
    scf.if %44 {
      %c0_50 = arith.constant 0 : index
      %c0_51 = arith.constant 0 : index
      %98 = vector.load %arg12[%c0_50, %c0_51] : memref<1x16xf32, #tpu.memory_space<vmem>>, vector<1x16xf32>
      %99 = vector.broadcast %98 : vector<1x16xf32> to vector<16x16xf32>
      %100 = arith.mulf %27, %99 : vector<16x16xf32>
      %cst_52 = arith.constant dense<0.000000e+00> : vector<16xf32>
      %101 = vector.multi_reduction <add>, %100, %cst_52 [1] : vector<16x16xf32> to vector<16xf32>
      %102 = vector.shape_cast %101 : vector<16xf32> to vector<16x1xf32>
      %c0_53 = arith.constant 0 : index
      %c0_54 = arith.constant 0 : index
      %103 = vector.load %arg14[%c0_53, %c0_54] : memref<16x1xf32, #tpu.memory_space<vmem>>, vector<16x1xf32>
      tpu.vector_store %arg14[%c0_53, %c0_54], %102 {strides = array<i32>} : memref<16x1xf32, #tpu.memory_space<vmem>>, vector<16x1xf32>,
    } else {
    }
    %c0_17 = arith.constant 0 : index
    %c0_18 = arith.constant 0 : index
    %45 = vector.load %arg14[%c0_17, %c0_18] : memref<16x1xf32, #tpu.memory_space<vmem>>, vector<16x1xf32>
    %46 = arith.subf %29, %45 : vector<16x1xf32>
    %c0_19 = arith.constant 0 : index
    %c0_20 = arith.constant 0 : index
    %47 = vector.load %arg10[%c0_19, %c0_20] : memref<16x1xf32, #tpu.memory_space<vmem>>, vector<16x1xf32>
    %c0_21 = arith.constant 0 : index
    %c0_22 = arith.constant 0 : index
    %48 = vector.load %arg11[%c0_21, %c0_22] : memref<16x1xf32, #tpu.memory_space<vmem>>, vector<16x1xf32>
    %49 = arith.mulf %46, %47 : vector<16x1xf32>
    %50 = vector.shape_cast %49 : vector<16x1xf32> to vector<1x16x1xf32>
    %cst_23 = arith.constant dense<0.000000e+00> : vector<1xf32>
    %51 = vector.multi_reduction <add>, %50, %cst_23 [1, 2] : vector<1x16x1xf32> to vector<1xf32>
    %52 = vector.shape_cast %51 : vector<1xf32> to vector<1x1x1xf32>
    %53 = vector.extract %52[0, 0, 0] : f32 from vector<1x1x1xf32>
    %54 = arith.mulf %45, %48 : vector<16x1xf32>
    %55 = vector.shape_cast %54 : vector<16x1xf32> to vector<1x16x1xf32>
    %cst_24 = arith.constant dense<0.000000e+00> : vector<1xf32>
    %56 = vector.multi_reduction <add>, %55, %cst_24 [1, 2] : vector<1x16x1xf32> to vector<1xf32>
    %57 = vector.shape_cast %56 : vector<1xf32> to vector<1x1x1xf32>
    %58 = vector.extract %57[0, 0, 0] : f32 from vector<1x1x1xf32>
    %59 = arith.mulf %45, %47 : vector<16x1xf32>
    %60 = vector.shape_cast %59 : vector<16x1xf32> to vector<1x16x1xf32>
    %cst_25 = arith.constant dense<0.000000e+00> : vector<1xf32>
    %61 = vector.multi_reduction <add>, %60, %cst_25 [1, 2] : vector<1x16x1xf32> to vector<1xf32>
    %62 = vector.shape_cast %61 : vector<1xf32> to vector<1x1x1xf32>
    %63 = vector.extract %62[0, 0, 0] : f32 from vector<1x1x1xf32>
    %64 = arith.mulf %46, %48 : vector<16x1xf32>
    %65 = vector.shape_cast %64 : vector<16x1xf32> to vector<1x16x1xf32>
    %cst_26 = arith.constant dense<0.000000e+00> : vector<1xf32>
    %66 = vector.multi_reduction <add>, %65, %cst_26 [1, 2] : vector<1x16x1xf32> to vector<1xf32>
    %67 = vector.shape_cast %66 : vector<1xf32> to vector<1x1x1xf32>
    %68 = vector.extract %67[0, 0, 0] : f32 from vector<1x1x1xf32>
    %69 = arith.addf %63, %68 : f32
    %70 = arith.index_cast %arg0 : i32 to index
    %71 = arith.index_cast %arg1 : i32 to index
    %72 = memref.load %arg5[%70, %71] : memref<1x1xf32, #tpu.memory_space<smem>>
    %c0_27 = arith.constant 0 : index
    %c0_28 = arith.constant 0 : index
    %c0_29 = arith.constant 0 : index
    %c0_30 = arith.constant 0 : index
    %73 = vector.load %arg13[%c0_27, %c0_28, %c0_29, %c0_30] : memref<1x3x8x128xf32, #tpu.memory_space<vmem>>, vector<1x1x8x128xf32>
    %74 = vector.shape_cast %73 : vector<1x1x8x128xf32> to vector<8x128xf32>
    %75 = arith.mulf %72, %53 : f32
    %76 = vector.broadcast %75 : f32 to vector<8x128xf32>
    %77 = arith.addf %74, %76 : vector<8x128xf32>
    %c0_31 = arith.constant 0 : index
    %c0_32 = arith.constant 0 : index
    %c0_33 = arith.constant 0 : index
    %c0_34 = arith.constant 0 : index
    %78 = vector.load %arg13[%c0_31, %c0_32, %c0_33, %c0_34] : memref<1x3x8x128xf32, #tpu.memory_space<vmem>>, vector<1x1x8x128xf32>
    %79 = vector.shape_cast %78 : vector<1x1x8x128xf32> to vector<8x128xf32>
    %80 = vector.shape_cast %77 : vector<8x128xf32> to vector<1x1x8x128xf32>
    tpu.vector_store %arg13[%c0_31, %c0_32, %c0_33, %c0_34], %80 {strides = array<i32>} : memref<1x3x8x128xf32, #tpu.memory_space<vmem>>, vector<1x1x8x128xf32>,
    %c0_35 = arith.constant 0 : index
    %c1 = arith.constant 1 : index
    %c0_36 = arith.constant 0 : index
    %c0_37 = arith.constant 0 : index
    %81 = vector.load %arg13[%c0_35, %c1, %c0_36, %c0_37] : memref<1x3x8x128xf32, #tpu.memory_space<vmem>>, vector<1x1x8x128xf32>
    %82 = vector.shape_cast %81 : vector<1x1x8x128xf32> to vector<8x128xf32>
    %cst_38 = arith.constant 5.000000e-01 : f32
    %83 = arith.mulf %cst_38, %72 : f32
    %84 = arith.mulf %83, %69 : f32
    %85 = vector.broadcast %84 : f32 to vector<8x128xf32>
    %86 = arith.addf %82, %85 : vector<8x128xf32>
    %c0_39 = arith.constant 0 : index
    %c1_40 = arith.constant 1 : index
    %c0_41 = arith.constant 0 : index
    %c0_42 = arith.constant 0 : index
    %87 = vector.load %arg13[%c0_39, %c1_40, %c0_41, %c0_42] : memref<1x3x8x128xf32, #tpu.memory_space<vmem>>, vector<1x1x8x128xf32>
    %88 = vector.shape_cast %87 : vector<1x1x8x128xf32> to vector<8x128xf32>
    %89 = vector.shape_cast %86 : vector<8x128xf32> to vector<1x1x8x128xf32>
    tpu.vector_store %arg13[%c0_39, %c1_40, %c0_41, %c0_42], %89 {strides = array<i32>} : memref<1x3x8x128xf32, #tpu.memory_space<vmem>>, vector<1x1x8x128xf32>,
    %c0_43 = arith.constant 0 : index
    %c2 = arith.constant 2 : index
    %c0_44 = arith.constant 0 : index
    %c0_45 = arith.constant 0 : index
    %90 = vector.load %arg13[%c0_43, %c2, %c0_44, %c0_45] : memref<1x3x8x128xf32, #tpu.memory_space<vmem>>, vector<1x1x8x128xf32>
    %91 = vector.shape_cast %90 : vector<1x1x8x128xf32> to vector<8x128xf32>
    %92 = arith.mulf %72, %58 : f32
    %93 = vector.broadcast %92 : f32 to vector<8x128xf32>
    %94 = arith.addf %91, %93 : vector<8x128xf32>
    %c0_46 = arith.constant 0 : index
    %c2_47 = arith.constant 2 : index
    %c0_48 = arith.constant 0 : index
    %c0_49 = arith.constant 0 : index
    %95 = vector.load %arg13[%c0_46, %c2_47, %c0_48, %c0_49] : memref<1x3x8x128xf32, #tpu.memory_space<vmem>>, vector<1x1x8x128xf32>
    %96 = vector.shape_cast %95 : vector<1x1x8x128xf32> to vector<8x128xf32>
    %97 = vector.shape_cast %94 : vector<8x128xf32> to vector<1x1x8x128xf32>
    tpu.vector_store %arg13[%c0_46, %c2_47, %c0_48, %c0_49], %97 {strides = array<i32>} : memref<1x3x8x128xf32, #tpu.memory_space<vmem>>, vector<1x1x8x128xf32>,
    return
  }
  func.func @transform_0(%arg0: i32, %arg1: i32, %arg2: memref<1xf32, #tpu.memory_space<smem>>, %arg3: memref<1x1xi32, #tpu.memory_space<smem>>, %arg4: memref<1x1xi32, #tpu.memory_space<smem>>, %arg5: memref<1x1xf32, #tpu.memory_space<smem>>) -> (i32, i32) {
    %0 = arith.index_cast %arg0 : i32 to index
    %1 = arith.index_cast %arg1 : i32 to index
    %2 = memref.load %arg3[%0, %1] : memref<1x1xi32, #tpu.memory_space<smem>>
    %c0_i32 = arith.constant 0 : i32
    %c0_i32_0 = arith.constant 0 : i32
    return %2, %c0_i32 : i32, i32
  }
  func.func @transform_1(%arg0: i32, %arg1: i32, %arg2: memref<1xf32, #tpu.memory_space<smem>>, %arg3: memref<1x1xi32, #tpu.memory_space<smem>>, %arg4: memref<1x1xi32, #tpu.memory_space<smem>>, %arg5: memref<1x1xf32, #tpu.memory_space<smem>>) -> (i32, i32) {
    %0 = arith.index_cast %arg0 : i32 to index
    %1 = arith.index_cast %arg1 : i32 to index
    %2 = memref.load %arg4[%0, %1] : memref<1x1xi32, #tpu.memory_space<smem>>
    %c0_i32 = arith.constant 0 : i32
    %c0_i32_0 = arith.constant 0 : i32
    return %2, %c0_i32 : i32, i32
  }
  func.func @transform_2(%arg0: i32, %arg1: i32, %arg2: memref<1xf32, #tpu.memory_space<smem>>, %arg3: memref<1x1xi32, #tpu.memory_space<smem>>, %arg4: memref<1x1xi32, #tpu.memory_space<smem>>, %arg5: memref<1x1xf32, #tpu.memory_space<smem>>) -> (i32, i32) {
    %0 = arith.index_cast %arg0 : i32 to index
    %1 = arith.index_cast %arg1 : i32 to index
    %2 = memref.load %arg3[%0, %1] : memref<1x1xi32, #tpu.memory_space<smem>>
    %c0_i32 = arith.constant 0 : i32
    %c0_i32_0 = arith.constant 0 : i32
    return %2, %c0_i32 : i32, i32
  }
  func.func @transform_3(%arg0: i32, %arg1: i32, %arg2: memref<1xf32, #tpu.memory_space<smem>>, %arg3: memref<1x1xi32, #tpu.memory_space<smem>>, %arg4: memref<1x1xi32, #tpu.memory_space<smem>>, %arg5: memref<1x1xf32, #tpu.memory_space<smem>>) -> (i32, i32) {
    %0 = arith.index_cast %arg0 : i32 to index
    %1 = arith.index_cast %arg1 : i32 to index
    %2 = memref.load %arg4[%0, %1] : memref<1x1xi32, #tpu.memory_space<smem>>
    %c0_i32 = arith.constant 0 : i32
    %c0_i32_0 = arith.constant 0 : i32
    return %c0_i32, %2 : i32, i32
  }
  func.func @transform_4(%arg0: i32, %arg1: i32, %arg2: memref<1xf32, #tpu.memory_space<smem>>, %arg3: memref<1x1xi32, #tpu.memory_space<smem>>, %arg4: memref<1x1xi32, #tpu.memory_space<smem>>, %arg5: memref<1x1xf32, #tpu.memory_space<smem>>) -> (i32, i32) {
    %0 = arith.index_cast %arg0 : i32 to index
    %1 = arith.index_cast %arg1 : i32 to index
    %2 = memref.load %arg3[%0, %1] : memref<1x1xi32, #tpu.memory_space<smem>>
    %c0_i32 = arith.constant 0 : i32
    %c0_i32_0 = arith.constant 0 : i32
    return %2, %c0_i32 : i32, i32
  }
  func.func @transform_5(%arg0: i32, %arg1: i32, %arg2: memref<1xf32, #tpu.memory_space<smem>>, %arg3: memref<1x1xi32, #tpu.memory_space<smem>>, %arg4: memref<1x1xi32, #tpu.memory_space<smem>>, %arg5: memref<1x1xf32, #tpu.memory_space<smem>>) -> (i32, i32) {
    %0 = arith.index_cast %arg0 : i32 to index
    %1 = arith.index_cast %arg1 : i32 to index
    %2 = memref.load %arg3[%0, %1] : memref<1x1xi32, #tpu.memory_space<smem>>
    %c0_i32 = arith.constant 0 : i32
    %c0_i32_0 = arith.constant 0 : i32
    return %2, %c0_i32 : i32, i32
  }
  func.func @transform_6(%arg0: i32, %arg1: i32, %arg2: memref<1xf32, #tpu.memory_space<smem>>, %arg3: memref<1x1xi32, #tpu.memory_space<smem>>, %arg4: memref<1x1xi32, #tpu.memory_space<smem>>, %arg5: memref<1x1xf32, #tpu.memory_space<smem>>) -> (i32, i32) {
    %0 = arith.index_cast %arg0 : i32 to index
    %1 = arith.index_cast %arg1 : i32 to index
    %2 = memref.load %arg4[%0, %1] : memref<1x1xi32, #tpu.memory_space<smem>>
    %c0_i32 = arith.constant 0 : i32
    %c0_i32_0 = arith.constant 0 : i32
    return %c0_i32, %2 : i32, i32
  }
  func.func @transform_7(%arg0: i32, %arg1: i32, %arg2: memref<1xf32, #tpu.memory_space<smem>>, %arg3: memref<1x1xi32, #tpu.memory_space<smem>>, %arg4: memref<1x1xi32, #tpu.memory_space<smem>>, %arg5: memref<1x1xf32, #tpu.memory_space<smem>>) -> (i32, i32, i32, i32) {
    %c0_i32 = arith.constant 0 : i32
    %c0_i32_0 = arith.constant 0 : i32
    %c0_i32_1 = arith.constant 0 : i32
    %c0_i32_2 = arith.constant 0 : i32
    return %arg0, %c0_i32, %c0_i32_0, %c0_i32_1 : i32, i32, i32, i32
  }
}

</mosaic_0001>

<bundles_post_ra>
// kernel: tpu_custom_call.1
= control target key start
LH: loop header
LB: loop body
LE: loop exit
PB: predicated region body
PF: predicated region fallthrough
CT: control target
= control target key end

     0   :  { %s842_s0 = inlined_call_operand.<no memory space> [shape: f32[1], index: 0, kind: input, shape index: {}]   ;;  %s843_s1 = inlined_call_operand.<no memory space> [shape: s32[1,1], index: 1, kind: input, shape index: {}]   ;;  %s844_s2 = inlined_call_operand.<no memory space> [shape: s32[1,1], index: 2, kind: input, shape index: {}]   ;;  %s845_s3 = inlined_call_operand.<no memory space> [shape: f32[1,1], index: 3, kind: input, shape index: {}]   ;;  %s846_s4 = inlined_call_operand.vmem [shape: f32[16,32], index: 4, kind: input, shape index: {}]   ;;  %s847_s5 = inlined_call_operand.vmem [shape: f32[16,32], index: 5, kind: input, shape index: {}]   ;;  %s848_s6 = inlined_call_operand.vmem [shape: f32[16,1], index: 6, kind: input, shape index: {}]   ;;  %s849_s7 = inlined_call_operand.vmem [shape: f32[1,16], index: 7, kind: input, shape index: {}]   ;;  %s850_s8 = inlined_call_operand.vmem [shape: f32[16,1], index: 8, kind: input, shape index: {}]   ;;  %s851_s9 = inlined_call_operand.vmem [shape: f32[16,1], index: 9, kind: input, shape index: {}]   ;;  %s852_s10 = inlined_call_operand.vmem [shape: f32[1,16], index: 10, kind: input, shape index: {}]   ;;  %s853_s11 = inlined_call_operand.hbm [shape: f32[1,3,8,128], index: 11, kind: output, shape index: {}]  }
   0x1   :  { %19 = sst [smem:[#allocation7]] %s845_s3 }
   0x2   :  { %20 = vsyncpa [#allocation9], 0  ;;  %s616_s21 = sshll.u32 %s844_s2, 1  ;;  %s614_s24 = sshll.u32 %s843_s1, 1  ;;  %v685_v0 = vmov 0.0   ;;  %v686_v1 = vmov 0   ;;  %v405_v18 = vstv %s842_s0 }
   0x3   :  { %p205_p0 = scmp.lt.s32.totalorder %s616_s21, 1  ;;  %282 = vst [vmem:[#allocation8] sm:$0xff] %v685_v0  ;;  %283 = vst [vmem:[#allocation8 + $0x8] sm:$0xff] %v685_v0  ;;  %p191_p1 = scmp.lt.s32.totalorder %s614_s24, 1  ;;  %658 = vset.pattern.permute.xlu0 %v686_v1  ;;  %vm289_vm0 = vcmask 261120   ;;  %vm428_vm1 = vcmask 130048  }
   0x4   :  { %284 = vst [vmem:[#allocation8 + $0x10] sm:$0xff] %v685_v0  ;;  %p232_p2 = scmp.lt.s32.totalorder %s844_s2, 0 }
   0x5   :  { %s856_s21 = smov (!%p205_p0, %s616_s21), 1  ;;  %s858_s24 = smov (!%p191_p1, %s614_s24), 1 }
   0x6   :  { %s617_s3 = sshll.u32 %s856_s21, 3  ;;  %s615_s29 = sshll.u32 %s858_s24, 3 }
   0x7   :  { %s208_s1 = scalar_lea.vmem %s847_s5, %s617_s3  ;;  %s194_s13 = scalar_lea.vmem %s846_s4, %s615_s29 }
   0x8   :  { %v287_v2 = vld [vmem:[%s208_s1] sm:$0xff]  ;;  %v288_v3 = vld [vmem:[%s208_s1 + $0x8] sm:$0xff]  ;;  %s772_s16 = scalar_lea.vmem %s850_s8, %s615_s29  ;;  %s778_s19 = scalar_lea.vmem %s851_s9, %s615_s29 }
   0x9   :  { %637 = vmatprep.subr.msk.mxu0 %vm289_vm0, %v288_v3  ;;  %v285_v4 = vld [vmem:[%s194_s13] sm:$0xff]  ;;  %s222_s21 = scalar_lea.vmem %s848_s6, %s615_s29  ;;  %v286_v7 = vld [vmem:[%s194_s13 + $0x8] sm:$0xff]  ;;  %s629_s29 = sshll.u32 %s844_s2, 4 }
   0xa   :  { %638 = vmatpush3.xpose.msk.msra.mxu0 %vm289_vm0, %v288_v3  ;;  %641 = vmatprep.mubr.msk.f32.mxu0 %vm289_vm0, %v285_v4  ;;  %v377_v5 = vld [vmem:[%s222_s21] sm:$0xff]  ;;  %s792_s24 = scalar_select %p232_p2, %s844_s2, 0  ;;  %v378_v6 = vld [vmem:[%s222_s21 + $0x8] sm:$0xff] }
   0xb   :  { %639 = vmatprep.subr.msk.mxu0 %vm289_vm0, %v287_v2  ;;  %382 = vperm.xlu0 %658, %v377_v5   ;;  %s440_s30 = sadd.s32 16, %s629_s29  ;;  %p442_p4 = scmp.ge.s32.totalorder %s629_s29, 8 }
   0xc   :  { %s273_s3 = scalar_lea.vmem %s852_s10, %s792_s24  ;;  %s234_s27 = scalar_lea.vmem %s849_s7, %s792_s24 }
   0xd   :  { %v628_v9 = vld [vmem:[%s234_s27] ss:$0 sm:$0xff]  ;;  %p813_p3 = scmp.le.s32.totalorder %s440_s30, 8  ;;  %p630_p5 = scmp.gt.s32.totalorder %s440_s30, 8 }
   0xe   :  { %640 = vmatpush3.xpose.msk.msra.mxu0 %vm289_vm0, %v287_v2 }
   0xf   :  { %387 = vperm.xlu0 %658, %v378_v6  }
  0x11   :  { %642 = vmatmul.mubr.msk.f32.vlgmr.msra.gmra.mxu0 %vm289_vm0, %v286_v7 }
  0x86   :  { %v383_v8 = vpop.permute.xlu0 %382 }
  0x87   :  { %v396_v13 = vadd.f32 %v628_v9, %v383_v8 }
  0x8a   :  { %v388_v10 = vpop.permute.xlu0 %387 }
  0x8b   :  { %v397_v11 = vadd.f32 %v628_v9, %v388_v10 }
  0xd1   :  { %v643_v12 = vpop.f32.mrf.mxu0 }
  0xd2   :  { %v399_v14 = vmul.f32 2.0, %v643_v12 }
  0xd3   :  { %v368_v15 = vpop.f32.mrf.mxu0 }
  0xd4   :  { %v401_v16 = vsub.f32 %v397_v11, %v399_v14  ;;  %v398_v17 = vmul.f32 2.0, %v368_v15 }
  0xd6   :  { %v403_v19 = vmax.f32 %v401_v16, 0.0  ;;  %v400_v20 = vsub.f32 %v396_v13, %v398_v17 }
  0xd8   :  { %v407_v21 = vmul.f32 %v405_v18, %v403_v19  ;;  %v402_v22 = vmax.f32 %v400_v20, 0.0 }
  0xda   :  { %v410_v23 = vmul.f32 1.442695, %v407_v21  ;;  %v406_v24 = vmul.f32 %v405_v18, %v402_v22 }
  0xdc   :  { %659 = vpow2.f32 %v410_v23  ;;  %v408_v25 = vmul.f32 1.442695, %v406_v24 }
  0xde   :  { %661 = vpow2.f32 %v408_v25 }
  0xe9   :  { %v660_v26 = vpop.eup %659 }
  0xea   :  { %v413_v27 = vmul.f32 %v660_v26, %v660_v26 }
  0xeb   :  { %v662_v28 = vpop.eup %661 }
  0xec   :  { %v412_v29 = vmul.f32 %v662_v28, %v662_v28  ;;  %v415_v30 = vmul.f32 %v413_v27, %v413_v27  ;;  %v419_v31 = vadd.f32 %v660_v26, %v413_v27 }
  0xee   :  { %v414_v32 = vmul.f32 %v412_v29, %v412_v29  ;;  %v418_v33 = vadd.f32 %v662_v28, %v412_v29  ;;  %v417_v34 = vmul.f32 %v415_v30, %v415_v30  ;;  %v421_v35 = vadd.f32 %v419_v31, %v415_v30 }
  0xf0   :  { %v416_v36 = vmul.f32 %v414_v32, %v414_v32  ;;  %v420_v37 = vadd.f32 %v418_v33, %v414_v32  ;;  %v423_v40 = vadd.f32 %v421_v35, %v417_v34  ;;  %v425_v41 = vmul.f32 %v417_v34, %v417_v34 }
  0xf2   :  { %v422_v38 = vadd.f32 %v420_v37, %v416_v36  ;;  %v424_v39 = vmul.f32 %v416_v36, %v416_v36  ;;  %v427_v44 = vadd.f32 %v425_v41, %v423_v40 }
  0xf4   :  { %v426_v42 = vadd.f32 %v424_v39, %v422_v38  ;;  %v432_v45 = vsel %vm428_vm1, %v427_v44, 0.0 }
  0xf6   :  { %v429_v43 = vsel %vm428_vm1, %v426_v42, 0.0 }
  0xf7   :  { %430 = vadd.xlane.f32.xlu1 %v429_v43 }
  0xfb   :  { %433 = vadd.xlane.f32.xlu1 %v432_v45 }
 0x180   :  { %v431_v46 = vpop.xlane.xlu1 %430  ;;  %445 = sbr.rel (%p630_p5) target bundleno = 391 (0x187), region = 37 }
 0x184   :  { %v434_v47 = vpop.xlane.xlu1 %433 }
 0x185   :  { %vm446_vm2 = vcmask 7168   ;;  %v687_v48 = vmov 0.0  }
 0x186   :  { %447 = vst.msk [vmem:[#allocation2] sm:$0xff] %vm446_vm2, %v687_v48  ;;  %448 = vst.msk [vmem:[#allocation2 + $0x8] sm:$0xff] %vm446_vm2, %v687_v48 }
 0x187 PF:  { %p631_p6 = scmp.lt.s32.totalorder %s629_s29, 8 }
 0x189   :  { %451 = sbr.rel (%p631_p6) target bundleno = 400 (0x190), region = 41 }
 0x18e   :  { %vm452_vm3 = vcmask 7168  }
 0x18f   :  { %453 = vst.msk [vmem:[#allocation2] sm:$0xff] %vm452_vm3, %v431_v46  ;;  %454 = vst.msk [vmem:[#allocation2 + $0x8] sm:$0xff] %vm452_vm3, %v434_v47 }
 0x190 PF:  { %p455_p7 = por %p442_p4, %p813_p3 }
 0x192   :  { %458 = sbr.rel (%p455_p7) target bundleno = 554 (0x22a), region = 45 }
 0x197   :  { %v632_v49 = vld [vmem:[%s273_s3] ss:$0 sm:$0xff]  ;;  %vm474_vm4 = vcmask 7168  }
 0x198   :  { %v466_v50 = vmul.f32 %v632_v49, %v426_v42  ;;  %v467_v51 = vmul.f32 %v632_v49, %v427_v44 }
 0x19a   :  { %v468_v52 = vsel %vm428_vm1, %v466_v50, 0.0  ;;  %v471_v53 = vsel %vm428_vm1, %v467_v51, 0.0 }
 0x19b   :  { %469 = vadd.xlane.f32.xlu0 %v468_v52 }
 0x19f   :  { %472 = vadd.xlane.f32.xlu0 %v471_v53 }
 0x224   :  { %v470_v54 = vpop.xlane.xlu0 %469 }
 0x225   :  { %475 = vst.msk [vmem:[#allocation2] sm:$0xff] %vm474_vm4, %v470_v54 }
 0x228   :  { %v473_v55 = vpop.xlane.xlu0 %472 }
 0x229   :  { %476 = vst.msk [vmem:[#allocation2 + $0x8] sm:$0xff] %vm474_vm4, %v473_v55 }
 0x22a PF:  { %v481_v58 = vld [vmem:[%s772_s16] sm:$0xff]  ;;  %vm487_vm5 = vcmask 7168   ;;  %v482_v59 = vld [vmem:[%s772_s16 + $0x8] sm:$0xff]  ;;  %s543_s10 = sld [smem:[#allocation7]]  ;;  %v544_v48 = vld [vmem:[#allocation8] sm:$0xff]  ;;  %s688_s21 = smov [#allocation8]  }
 0x22b   :  { %v483_v63 = vld [vmem:[%s778_s19] sm:$0xff]  ;;  %v484_v0 = vld [vmem:[%s778_s19 + $0x8] sm:$0xff]  ;;  %s567_s4 = sshll.u32 %s688_s21, 4  ;;  %v550_v54 = vld [vmem:[#allocation8 + $0x8] sm:$0xff]  ;;  %s568_s4 = int_to_ptr.vmem [resolvable:$true] %s567_s4 }
 0x22c   :  { %v477_v56 = vld [vmem:[#allocation2] sm:$0xff]  ;;  %s663_s22 = scalar_lea.vmem %s568_s4, 384  ;;  %p668_p9 = scmp.lt.s32.totalorder %s568_s4, %s568_s4 }
 0x22d   :  { %v514_v60 = vmul.f32 %v481_v58, %v477_v56  ;;  %v479_v61 = vsub.f32 %v431_v46, %v477_v56  ;;  %v500_v2 = vmul.f32 %v483_v63, %v477_v56  ;;  %v557_v51 = vld [vmem:[#allocation8 + $0x10] sm:$0xff]  ;;  %p664_p8 = scmp.ne.s32.totalorder %s568_s4, %s663_s22  ;;  %p669_p10 = scmp.lt.s32.totalorder %s663_s22, %s663_s22 }
 0x22f   :  { %v516_v4 = vsel %vm487_vm5, %v514_v60, 0.0  ;;  %v485_v5 = vmul.f32 %v481_v58, %v479_v61  ;;  %v528_v7 = vmul.f32 %v483_v63, %v479_v61  ;;  %v502_v10 = vsel %vm487_vm5, %v500_v2, 0.0  ;;  %p670_p11 = por %p669_p10, %p668_p9 }
 0x230   :  { %v478_v57 = vld [vmem:[#allocation2 + $0x8] sm:$0xff]  ;;  %s551_s16 = smul.f32 0.5, %s543_s10 }
 0x231   :  { %v480_v62 = vsub.f32 %v434_v47, %v478_v57  ;;  %v515_v1 = vmul.f32 %v482_v59, %v478_v57  ;;  %v501_v3 = vmul.f32 %v484_v0, %v478_v57  ;;  %v488_v13 = vsel %vm487_vm5, %v485_v5, 0.0  ;;  %p671_p12 = pnand %p670_p11, %p664_p8 }
 0x232   :  { %v530_v15 = vsel %vm487_vm5, %v528_v7, 0.0 }
 0x233   :  { %v486_v6 = vmul.f32 %v482_v59, %v480_v62  ;;  %v517_v8 = vsel %vm487_vm5, %v515_v1, 0.0  ;;  %v529_v9 = vmul.f32 %v484_v0, %v480_v62  ;;  %v503_v11 = vsel %vm487_vm5, %v501_v3, 0.0 }
 0x234   :  { %v518_v12 = vadd.f32 %v517_v8, %v516_v4  ;;  %v504_v19 = vadd.f32 %v503_v11, %v502_v10 }
 0x235   :  { %v489_v14 = vsel %vm487_vm5, %v486_v6, 0.0  ;;  %v531_v17 = vsel %vm487_vm5, %v529_v9, 0.0 }
 0x236   :  { %v490_v16 = vadd.f32 %v489_v14, %v488_v13  ;;  %519 = vadd.xlane.f32.xlu1 %v518_v12  ;;  %v532_v18 = vadd.f32 %v531_v17, %v530_v15 }
 0x238   :  { %491 = vadd.xlane.f32.xlu0 %v490_v16 }
 0x23a   :  { %533 = vadd.xlane.f32.xlu1 %v532_v18 }
 0x23c   :  { %505 = vadd.xlane.f32.xlu0 %v504_v19 }
 0x2bf   :  { %v520_v20 = vpop.xlane.xlu1 %519 }
 0x2c0   :  { %v521_v21 = vrot.slane %v520_v20, 4 }
 0x2c1   :  { %v492_v22 = vpop.xlane.xlu0 %491 }
 0x2c2   :  { %v493_v23 = vrot.slane %v492_v22, 4  ;;  %v522_v24 = vadd.f32 %v521_v21, %v520_v20 }
 0x2c3   :  { %v534_v26 = vpop.xlane.xlu1 %533 }
 0x2c4   :  { %v494_v25 = vadd.f32 %v493_v23, %v492_v22  ;;  %v523_v27 = vrot.slane %v522_v24, 2  ;;  %v535_v28 = vrot.slane %v534_v26, 4 }
 0x2c5   :  { %v506_v29 = vpop.xlane.xlu0 %505 }
 0x2c6   :  { %v495_v30 = vrot.slane %v494_v25, 2  ;;  %v507_v31 = vrot.slane %v506_v29, 4  ;;  %v536_v32 = vadd.f32 %v535_v28, %v534_v26  ;;  %v524_v36 = vadd.f32 %v523_v27, %v522_v24 }
 0x2c8   :  { %v508_v33 = vadd.f32 %v507_v31, %v506_v29  ;;  %v496_v34 = vadd.f32 %v495_v30, %v494_v25  ;;  %v537_v35 = vrot.slane %v536_v32, 2  ;;  %v525_v42 = vrot.slane %v524_v36, 1 }
 0x2ca   :  { %v509_v37 = vrot.slane %v508_v33, 2  ;;  %v497_v38 = vrot.slane %v496_v34, 1  ;;  %v538_v39 = vadd.f32 %v537_v35, %v536_v32  ;;  %v526_v46 = vadd.f32 %v525_v42, %v524_v36 }
 0x2cc   :  { %v510_v40 = vadd.f32 %v509_v37, %v508_v33  ;;  %v498_v41 = vadd.f32 %v497_v38, %v496_v34  ;;  %v539_v44 = vrot.slane %v538_v39, 1 }
 0x2ce   :  { %644 = vpush %v498_v41  ;;  %v511_v43 = vrot.slane %v510_v40, 1  ;;  %v540_v47 = vadd.f32 %v539_v44, %v538_v39 }
 0x2d0   :  { %v512_v45 = vadd.f32 %v511_v43, %v510_v40 }
 0x2d2   :  { %646 = vpush %v512_v45 }
 0x2d3   :  { %648 = vpush %v526_v46 }
 0x2d4   :  { %650 = vpush %v540_v47 }
 0x2ff   :  { %s645_s14 = spop %644 }
 0x300   :  { %s545_s15 = smul.f32 %s645_s14, %s543_s10 }
 0x302   :  { %v546_v49 = vstv %s545_s15 }
 0x303   :  { %v547_v50 = vadd.f32 %v546_v49, %v544_v48  ;;  %s647_s17 = spop %646 }
 0x304   :  { %s558_s18 = smul.f32 %s647_s17, %s543_s10  ;;  %s649_s19 = spop %648 }
 0x305   :  { %548 = vst [vmem:[#allocation8] sm:$0xff] %v547_v50  ;;  %s651_s5 = spop %650 }
 0x306   :  { %v559_v52 = vstv %s558_s18  ;;  %s542_s20 = sadd.f32 %s651_s5, %s649_s19 }
 0x307   :  { %v560_v53 = vadd.f32 %v559_v52, %v557_v51 }
 0x308   :  { %s552_s8 = smul.f32 %s551_s16, %s542_s20 }
 0x309   :  { %561 = vst [vmem:[#allocation8 + $0x10] sm:$0xff] %v560_v53 }
 0x30a   :  { %v553_v55 = vstv %s552_s8 }
 0x30b   :  { %v554_v56 = vadd.f32 %v553_v55, %v550_v54 }
 0x30d   :  { %555 = vst [vmem:[#allocation8 + $0x8] sm:$0xff] %v554_v56 }
 0x30e   :  { %674 = shalt.err (!%p671_p12)
}
 0x30f   :  { %s689_s23 = smov 128   ;;  %s690_s24 = smov 8  }
 0x310   :  { %573 = dma.vmem_to_hbm [thread:$0]  %s568_s4, 384, %s853_s11, [#allocation9], %s689_s23, %s689_s23, %s690_s24  }
 0x311   :  { %683 = dma.done.wait [#allocation9], 384  }
 0x312   :  { %684 = vsyncadd [#allocation9], 4294966912 }
 0x313   :  { %577 = vsyncpa [#allocation9], 1 }

</bundles_post_ra>
